<compile_context>
chip_gen: v5e
topology: v5e:2x2
jax: 0.10.0
libtpu: 0.0.40
codegen_flags: <defaults>
</compile_context>

<pallas_src>
import jax
import jax.numpy as jnp
from jax.experimental import pallas as pl
from jax.experimental.pallas import tpu as pltpu

# Small, module-consistent shapes (original: 3, 448, 128, 512).
IMG_DEPTH = 3
IMG_SIZE = 16
PATCH_SIZE = 8
EMBEDING_DEPTH = 128
NUM_PATCH_1D = IMG_SIZE // PATCH_SIZE                 # 2
NUM_PATCHES = NUM_PATCH_1D * NUM_PATCH_1D             # 4
PATCH_SEQUENCE = NUM_PATCHES + 1                      # 5
PATCH_K = IMG_DEPTH * PATCH_SIZE * PATCH_SIZE         # 192


def _patch_matmul_kernel(p_ref, w_ref, o_ref, acc_ref):
    """Tiled matmul with f32 accumulation over the K grid axis.

    p_ref: (tm, tk)  w_ref: (tk, D)  o_ref: (tm, D) f32  acc_ref: (tm, D) f32
    """
    k = pl.program_id(1)

    @pl.when(k == 0)
    def _init():
        acc_ref[...] = jnp.zeros_like(acc_ref)

    acc_ref[...] += jnp.dot(p_ref[...], w_ref[...],
                            preferred_element_type=jnp.float32)

    @pl.when(k == pl.num_programs(1) - 1)
    def _finalize():
        o_ref[...] = acc_ref[...].astype(o_ref.dtype)


def _divisor_tile(full, target, align):
    """Largest divisor of `full` that is a multiple of `align` and <= target.

    Falls back to `full` (one full-extent block, always legal) if none exists,
    so no zero-padding of the operands is ever required.
    """
    if full <= target:
        return full
    t = (min(target, full) // align) * align
    while t >= align:
        if full % t == 0:
            return t
        t -= align
    return full


def _num_tensorcores():
    """Best-effort TensorCore count (2 on v7x, 1 on v5e/v6e); safe fallback 1."""
    try:
        info = pltpu.get_tpu_info()
    except Exception:
        return 1
    for name in ("num_cores", "core_count", "num_tensorcores"):
        n = getattr(info, name, None)
        if isinstance(n, int) and n > 0:
            return max(1, min(int(n), 2))
    return 1


def prepare_patch_embedding_params(conv_w, conv_b, cls_token, pos_token, *,
                                   compute_dtype=jnp.float32):
    """Hoist per-call parameter preprocessing out of the forward path.

    compute_dtype: matmul operand dtype.  bf16 is recommended on v5e, v6e and
    v7x alike (the kernel is HBM-bound and all three MXUs are natively bf16);
    accumulation stays f32 either way.  Default f32 matches PyTorch exactly.
    """
    D, C, P, _ = conv_w.shape
    K = C * P * P
    N = pos_token.shape[0] - 1
    w_mat = conv_w.reshape(D, K).T.astype(compute_dtype)               # (K, D)
    add_tbl = (conv_b[None, :] + pos_token[:N, :]).astype(jnp.float32)  # (N, D)
    cls_row = (cls_token[0] + pos_token[N]).astype(jnp.float32)         # (D,)
    return dict(w_mat=w_mat, add_tbl=add_tbl, cls_row=cls_row,
                patch_size=P, in_channels=C, embed_dim=D,
                compute_dtype=compute_dtype)


def patch_embedding_forward(x, params, *, m_tile=None, k_tile=None):
    """x: (B, C, H, W) float32 NCHW.  Returns (B, N+1, D) float32.

    m_tile / k_tile: override the auto tile selection (rows of the B*N matmul
    M axis / columns of the K contraction axis per grid step).
    """
    P = params["patch_size"]
    C = params["in_channels"]
    D = params["embed_dim"]
    cdt = params["compute_dtype"]
    w_mat, add_tbl, cls_row = params["w_mat"], params["add_tbl"], params["cls_row"]

    B, Cx, H, W = x.shape
    assert Cx == C
    Ho = (H - P) // P + 1
    Wo = (W - P) // P + 1
    N = Ho * Wo
    K = C * P * P
    assert add_tbl.shape == (N, D), "pos_token must have N+1 rows"
    assert w_mat.shape == (K, D)

    # ---- patch extraction (wrapper glue) --------------------------------
    # Cast BEFORE the transpose so the materialized patch copy is already the
    # narrow dtype.  Ordering: einops 'b d w h -> b (w h) d' labels the conv
    # output's H axis 'w' and its W axis 'h', so the sequence is H-major /
    # W-minor, i.e. row = ho * Wo + wo -- exactly what this transpose gives.
    # K layout (C, Ph, Pw) matches conv_w.reshape(D, K).
    x_c = x[:, :, : Ho * P, : Wo * P].astype(cdt)
    patches = (x_c.reshape(B, C, Ho, P, Wo, P)
               .transpose(0, 2, 4, 1, 3, 5)
               .reshape(B * N, K))
    # TODO(synk): at production shapes this transpose is the dominant extra HBM
    # pass; allow_input_fusion below lets XLA fold it into the kernel's input
    # DMA, otherwise move patch extraction into the kernel itself.

    M = B * N

    # ---- tile / grid selection (gated on problem size) -------------------
    if m_tile is None:
        tm = _divisor_tile(M, 512, 8)
        if tm == M and M >= 128:
            # Single M block but lots of rows: try splitting across
            # TensorCores (v7x has 2; v5e/v6e stay fully collapsed).
            n_tc = _num_tensorcores()
            if n_tc > 1 and M % (8 * n_tc) == 0:
                tm = _divisor_tile(M // n_tc, 512, 8)
    else:
        tm = m_tile
        assert M % tm == 0 and (tm == M or tm % 8 == 0), \
            "m_tile must divide B*N and be a multiple of 8 (or equal B*N)"

    if k_tile is None:
        tk = _divisor_tile(K, 2048, 128)   # K left unpadded (e.g. 192 on v5e)
    else:
        tk = k_tile
        assert K % tk == 0 and (tk == K or tk % 128 == 0), \
            "k_tile must divide K and be a multiple of 128 (or equal K)"

    grid = (M // tm, K // tk)

    in_bytes = jnp.dtype(cdt).itemsize
    need = 2 * (tm * tk + tk * D) * in_bytes + 3 * tm * D * 4
    vmem_limit = int(min(64 * 2**20, max(32 * 2**20, 2 * need)))

    out_flat = pl.pallas_call(
        _patch_matmul_kernel,
        out_shape=jax.ShapeDtypeStruct((M, D), jnp.float32),
        grid_spec=pltpu.PrefetchScalarGridSpec(
            num_scalar_prefetch=0,
            grid=grid,
            in_specs=[
                pl.BlockSpec((tm, tk), lambda i, k: (i, k)),
                pl.BlockSpec((tk, D), lambda i, k: (k, 0)),
            ],
            out_specs=pl.BlockSpec((tm, D), lambda i, k: (i, 0)),
            scratch_shapes=[pltpu.VMEM((tm, D), jnp.float32)],
        ),
        compiler_params=pltpu.CompilerParams(
            dimension_semantics=("parallel", "arbitrary"),
            allow_input_fusion=[True, True],
            vmem_limit_bytes=vmem_limit,
        ),
    )(patches, w_mat)

    # ---- epilogue (wrapper glue, single fused XLA pass over (B, N, D)) ----
    # conv bias + position add and the batch-invariant cls row are applied
    # here; XLA fuses the add into the concat copy, so this costs no extra
    # HBM traffic versus doing it in-kernel while removing zero-padded rows
    # and the B-tiled additive table from the matmul entirely.
    emb = out_flat.reshape(B, N, D) + add_tbl[None, :, :]
    cls = jnp.broadcast_to(cls_row[None, None, :], (B, 1, D))
    return jnp.concatenate([emb, cls], axis=1)


if __name__ == "__main__":
    key = jax.random.PRNGKey(0)
    k_x, k_w, k_b, k_cls, k_pos = jax.random.split(key, 5)

    B = 2
    x = jax.random.normal(k_x, (B, IMG_DEPTH, IMG_SIZE, IMG_SIZE), jnp.float32)

    conv_w = jax.random.normal(
        k_w, (EMBEDING_DEPTH, IMG_DEPTH, PATCH_SIZE, PATCH_SIZE), jnp.float32) * 0.02
    conv_b = jax.random.normal(k_b, (EMBEDING_DEPTH,), jnp.float32) * 0.02
    cls_token = jax.random.normal(k_cls, (1, EMBEDING_DEPTH), jnp.float32)
    pos_token = jax.random.normal(k_pos, (PATCH_SEQUENCE, EMBEDING_DEPTH), jnp.float32)

    # Independent reference: a real convolution (HIGHEST precision) followed by
    # the einops rearrange ('b d w h -> b (w h) d' == H-major flatten), the cls
    # concat and the position add -- this catches patch-ordering bugs that a
    # matmul-based self-check using the same transpose could not.
    conv_out = jax.lax.conv_general_dilated(
        x, conv_w, window_strides=(PATCH_SIZE, PATCH_SIZE), padding="VALID",
        dimension_numbers=("NCHW", "OIHW", "NCHW"),
        precision=jax.lax.Precision.HIGHEST)                 # (B, D, Ho, Wo)
    emb_ref = (conv_out.transpose(0, 2, 3, 1)
               .reshape(B, NUM_PATCHES, EMBEDING_DEPTH) + conv_b)
    ref = jnp.concatenate(
        [emb_ref, jnp.broadcast_to(cls_token[None], (B, 1, EMBEDING_DEPTH))],
        axis=1)
    ref = ref + pos_token[None]

    # f32 path (faithful to the PyTorch module numerics).
    params_f32 = prepare_patch_embedding_params(
        conv_w, conv_b, cls_token, pos_token, compute_dtype=jnp.float32)
    out_f32 = jax.block_until_ready(patch_embedding_forward(x, params_f32))
    assert out_f32.shape == (B, PATCH_SEQUENCE, EMBEDING_DEPTH)
    assert out_f32.dtype == jnp.float32
    assert jnp.allclose(out_f32, ref, atol=1e-3, rtol=1e-3)

    # bf16-operand path (recommended on v5e/v6e/v7x: HBM-bound kernel, f32
    # accumulation).  Dtype-aware tolerance.
    params_bf16 = prepare_patch_embedding_params(
        conv_w, conv_b, cls_token, pos_token, compute_dtype=jnp.bfloat16)
    out_bf16 = jax.block_until_ready(patch_embedding_forward(x, params_bf16))
    assert out_bf16.shape == (B, PATCH_SEQUENCE, EMBEDING_DEPTH)
    assert jnp.allclose(out_bf16, ref, atol=5e-2, rtol=5e-2)

    print("KERNEL_OK")
</pallas_src>

<mosaic_0001>
module attributes {stable_mosaic.version = 11 : i64} {
  func.func @_patch_matmul_kernel(%arg0: i32, %arg1: i32, %arg2: memref<8x192xf32, #tpu.memory_space<vmem>>, %arg3: memref<192x128xf32, #tpu.memory_space<vmem>>, %arg4: memref<8x128xf32, #tpu.memory_space<vmem>>, %arg5: memref<8x128xf32, #tpu.memory_space<vmem>>) attributes {dimension_semantics = [#tpu.dimension_semantics<parallel>, #tpu.dimension_semantics<arbitrary>], iteration_bounds = array<i64: 1, 1>, scalar_prefetch = 0 : i64, scratch_operands = 1 : i64, tpu.core_type = #tpu.core_type<tc>, window_params = [{transform_indices = @transform_0, window_bounds = array<i64: 8, 192>}, {transform_indices = @transform_1, window_bounds = array<i64: 192, 128>}, {transform_indices = @transform_2, window_bounds = array<i64: 8, 128>}]} {
    %c0_i32 = arith.constant 0 : i32
    %0 = arith.cmpi eq, %arg1, %c0_i32 : i32
    %1 = arith.extui %0 : i1 to i32
    %c0_i32_0 = arith.constant 0 : i32
    %2 = arith.cmpi ne, %1, %c0_i32_0 : i32
    scf.if %2 {
      %cst_10 = arith.constant 0.000000e+00 : f32
      %12 = vector.broadcast %cst_10 : f32 to vector<8x128xf32>
      %c0_11 = arith.constant 0 : index
      %c0_12 = arith.constant 0 : index
      %13 = vector.load %arg5[%c0_11, %c0_12] : memref<8x128xf32, #tpu.memory_space<vmem>>, vector<8x128xf32>
      tpu.vector_store %arg5[%c0_11, %c0_12], %12 {strides = array<i32>} : memref<8x128xf32, #tpu.memory_space<vmem>>, vector<8x128xf32>,
    } else {
    }
    %c0 = arith.constant 0 : index
    %c0_1 = arith.constant 0 : index
    %3 = vector.load %arg5[%c0, %c0_1] : memref<8x128xf32, #tpu.memory_space<vmem>>, vector<8x128xf32>
    %c0_2 = arith.constant 0 : index
    %c0_3 = arith.constant 0 : index
    %4 = vector.load %arg2[%c0_2, %c0_3] : memref<8x192xf32, #tpu.memory_space<vmem>>, vector<8x192xf32>
    %c0_4 = arith.constant 0 : index
    %c0_5 = arith.constant 0 : index
    %5 = vector.load %arg3[%c0_4, %c0_5] : memref<192x128xf32, #tpu.memory_space<vmem>>, vector<192x128xf32>
    %cst = arith.constant dense<0.000000e+00> : vector<8x128xf32>
    %6 = tpu.matmul %4, %5, %cst {dimension_numbers = #tpu.dot_dimension_numbers<[1], [0], [0], [1], [0, 0, 1, 1], [], []>} : vector<8x192xf32>, vector<192x128xf32>, vector<8x128xf32> -> vector<8x128xf32>
    %7 = arith.addf %3, %6 : vector<8x128xf32>
    %c0_6 = arith.constant 0 : index
    %c0_7 = arith.constant 0 : index
    %8 = vector.load %arg5[%c0_6, %c0_7] : memref<8x128xf32, #tpu.memory_space<vmem>>, vector<8x128xf32>
    tpu.vector_store %arg5[%c0_6, %c0_7], %7 {strides = array<i32>} : memref<8x128xf32, #tpu.memory_space<vmem>>, vector<8x128xf32>,
    %c0_i32_8 = arith.constant 0 : i32
    %9 = arith.cmpi eq, %arg1, %c0_i32_8 : i32
    %10 = arith.extui %9 : i1 to i32
    %c0_i32_9 = arith.constant 0 : i32
    %11 = arith.cmpi ne, %10, %c0_i32_9 : i32
    scf.if %11 {
      %c0_10 = arith.constant 0 : index
      %c0_11 = arith.constant 0 : index
      %12 = vector.load %arg5[%c0_10, %c0_11] : memref<8x128xf32, #tpu.memory_space<vmem>>, vector<8x128xf32>
      %c0_12 = arith.constant 0 : index
      %c0_13 = arith.constant 0 : index
      %13 = vector.load %arg4[%c0_12, %c0_13] : memref<8x128xf32, #tpu.memory_space<vmem>>, vector<8x128xf32>
      tpu.vector_store %arg4[%c0_12, %c0_13], %12 {strides = array<i32>} : memref<8x128xf32, #tpu.memory_space<vmem>>, vector<8x128xf32>,
    } else {
    }
    return
  }
  func.func @transform_0(%arg0: i32, %arg1: i32) -> (i32, i32) {
    %c0_i32 = arith.constant 0 : i32
    return %arg0, %arg1 : i32, i32
  }
  func.func @transform_1(%arg0: i32, %arg1: i32) -> (i32, i32) {
    %c0_i32 = arith.constant 0 : i32
    %c0_i32_0 = arith.constant 0 : i32
    return %arg1, %c0_i32 : i32, i32
  }
  func.func @transform_2(%arg0: i32, %arg1: i32) -> (i32, i32) {
    %c0_i32 = arith.constant 0 : i32
    %c0_i32_0 = arith.constant 0 : i32
    return %arg0, %c0_i32 : i32, i32
  }
}

</mosaic_0001>

<bundles_post_ra>
// kernel: tpu_custom_call.1
= control target key start
LH: loop header
LB: loop body
LE: loop exit
PB: predicated region body
PF: predicated region fallthrough
CT: control target
= control target key end

     0   :  { %7 = vsyncpa [#allocation4], 0  ;;  %s256_s0 = inlined_call_operand.hbm [shape: f32[8,192], index: 0, kind: input, shape index: {}]   ;;  %s257_s1 = inlined_call_operand.hbm [shape: f32[192,128], index: 1, kind: input, shape index: {}]   ;;  %s258_s2 = inlined_call_operand.hbm [shape: f32[8,128], index: 2, kind: output, shape index: {}]  }
   0x1   :  { %8 = vsyncpa [#allocation7], 0 }
   0x2   :  { %9 = vsyncpa [#allocation5], 0  ;;  %s15_s11 = sshll.u32 %s256_s0, 4  ;;  %s227_s12 = smov [#allocation3]   ;;  %s16_s11 = int_to_ptr.hbm [resolvable:$true] %s15_s11 }
   0x3   :  { %s17_s13 = sshll.u32 %s227_s12, 4  ;;  %s25_s16 = sshll.u32 %s257_s1, 4  ;;  %s18_s13 = int_to_ptr.vmem [resolvable:$true] %s17_s13  ;;  %s26_s16 = int_to_ptr.hbm [resolvable:$true] %s25_s16 }
   0x4   :  { %20 = dma.hbm_to_vmem [thread:$0]  %s16_s11, 256, %s18_s13, [#allocation4]  }
   0x5   :  { %s228_s17 = smov [#allocation6]   ;;  %s229_s19 = smov 128  }
   0x6   :  { %s27_s18 = sshll.u32 %s228_s17, 4  ;;  %s230_s20 = smov 8   ;;  %s28_s18 = int_to_ptr.vmem [resolvable:$true] %s27_s18 }
   0x7   :  { %33 = dma.hbm_to_vmem [thread:$0]  %s26_s16, 3072, %s28_s18, [#allocation7], %s229_s19, %s229_s19, %s230_s20  }
   0x8   :  { %221 = dma.done.wait [#allocation4], 256  }
   0x9   :  { %222 = vsyncadd [#allocation4], 4294967040 }
   0xa   :  { %223 = dma.done.wait [#allocation7], 3072  }
   0xb   :  { %224 = vsyncadd [#allocation7], 4294964224  ;;  %v65_v0 = vld [vmem:[#allocation6 + $0x78] sm:$0xff]  ;;  %v64_v1 = vld [vmem:[#allocation6 + $0x70] sm:$0xff]  ;;  %vm74_vm0 = vcmask 523264   ;;  %s231_s0 = smov [#allocation8]  }
   0xc   :  { %78 = vmatpush.msra.mxu0 %v65_v0  ;;  %v63_v2 = vld [vmem:[#allocation6 + $0x68] sm:$0xff]  ;;  %v73_v3 = vld [vmem:[#allocation6 + $0xb8] sm:$0xff]  ;;  %v72_v4 = vld [vmem:[#allocation6 + $0xb0] sm:$0xff]  ;;  %s130_s1 = sshll.u32 %s231_s0, 4  ;;  %s132_s23 = sshll.u32 %s258_s2, 4  ;;  %s131_s1 = int_to_ptr.vmem [resolvable:$true] %s130_s1  ;;  %s133_s23 = int_to_ptr.hbm [resolvable:$true] %s132_s23 }
   0xd   :  { %v62_v5 = vld [vmem:[#allocation6 + $0x60] sm:$0xff]  ;;  %106 = vmatpush.msra.mxu1 %v73_v3  ;;  %v71_v6 = vld [vmem:[#allocation6 + $0xa8] sm:$0xff]  ;;  %v61_v7 = vld [vmem:[#allocation6 + $0x58] sm:$0xff] }
   0xe   :  { %79 = vmatpush.msra.mxu0 %v64_v1  ;;  %v70_v8 = vld [vmem:[#allocation6 + $0xa0] sm:$0xff]  ;;  %v60_v9 = vld [vmem:[#allocation6 + $0x50] sm:$0xff]  ;;  %v69_v10 = vld [vmem:[#allocation6 + $0x98] sm:$0xff] }
   0xf   :  { %107 = vmatpush.msra.mxu1 %v72_v4  ;;  %v59_v11 = vld [vmem:[#allocation6 + $0x48] sm:$0xff]  ;;  %v68_v12 = vld [vmem:[#allocation6 + $0x90] sm:$0xff]  ;;  %v58_v13 = vld [vmem:[#allocation6 + $0x40] sm:$0xff] }
  0x10   :  { %80 = vmatpush.msra.mxu0 %v63_v2  ;;  %v67_v14 = vld [vmem:[#allocation6 + $0x88] sm:$0xff]  ;;  %v57_v15 = vld [vmem:[#allocation6 + $0x38] sm:$0xff]  ;;  %v66_v16 = vld [vmem:[#allocation6 + $0x80] sm:$0xff] }
  0x11   :  { %108 = vmatpush.msra.mxu1 %v71_v6  ;;  %v56_v17 = vld [vmem:[#allocation6 + $0x30] sm:$0xff]  ;;  %v49_v18 = vld [vmem:[#allocation3 + $0x8] sm:$0xff]  ;;  %v55_v19 = vld [vmem:[#allocation6 + $0x28] sm:$0xff] }
  0x12   :  { %81 = vmatpush.msra.mxu0 %v62_v5  ;;  %v54_v20 = vld [vmem:[#allocation6 + $0x20] sm:$0xff]  ;;  %v53_v21 = vld [vmem:[#allocation6 + $0x18] sm:$0xff]  ;;  %v52_v22 = vld [vmem:[#allocation6 + $0x10] sm:$0xff] }
  0x13   :  { %109 = vmatpush.msra.mxu1 %v70_v8  ;;  %v51_v23 = vld [vmem:[#allocation6 + $0x8] sm:$0xff]  ;;  %v50_v24 = vld [vmem:[#allocation6] sm:$0xff]  ;;  %v48_v25 = vld [vmem:[#allocation3] sm:$0xff] }
  0x14   :  { %82 = vmatpush.msra.mxu0 %v61_v7 }
  0x15   :  { %110 = vmatpush.msra.mxu1 %v69_v10 }
  0x16   :  { %83 = vmatpush.msra.mxu0 %v60_v9 }
  0x17   :  { %111 = vmatpush.msra.mxu1 %v68_v12 }
  0x18   :  { %84 = vmatpush.msra.mxu0 %v59_v11 }
  0x19   :  { %112 = vmatpush.msra.mxu1 %v67_v14 }
  0x1a   :  { %85 = vmatpush.msra.mxu0 %v58_v13 }
  0x1b   :  { %113 = vmatpush.msra.mxu1 %v66_v16 }
  0x1c   :  { %86 = vmatpush.msra.mxu0 %v57_v15  ;;  %143 = vmatmul.msk.f32.vlgmr.msra.gmra.mxu1 %vm74_vm0, %v49_v18 }
  0x1e   :  { %87 = vmatpush.msra.mxu0 %v56_v17 }
  0x20   :  { %88 = vmatpush.msra.mxu0 %v55_v19 }
  0x22   :  { %89 = vmatpush.msra.mxu0 %v54_v20 }
  0x24   :  { %90 = vmatpush.msra.mxu0 %v53_v21 }
  0x26   :  { %91 = vmatpush.msra.mxu0 %v52_v22 }
  0x28   :  { %92 = vmatpush.msra.mxu0 %v51_v23 }
  0x2a   :  { %93 = vmatpush.msra.mxu0 %v50_v24 }
  0x2b   :  { %94 = vmatmul.f32.vlgmr.msra.gmra.mxu0 %v48_v25 }
  0x99   :  { %v115_v26 = vpop.f32.mrf.mxu1 }
  0xa8   :  { %v95_v27 = vpop.f32.mrf.mxu0 }
  0xa9   :  { %v116_v28 = vadd.f32 %v115_v26, %v95_v27 }
  0xab   :  { %124 = vst [vmem:[#allocation8] sm:$0xff] %v116_v28 }
  0xac   :  { %135 = dma.vmem_to_hbm [thread:$0]  %s131_s1, 128, %s133_s23, [#allocation5]  }
  0xad   :  { %225 = dma.done.wait [#allocation5], 128  }
  0xae   :  { %226 = vsyncadd [#allocation5], 4294967168 }
  0xaf   :  { %140 = vsyncpa [#allocation4], 1 }
  0xb0   :  { %141 = vsyncpa [#allocation7], 1 }
  0xb1   :  { %142 = vsyncpa [#allocation5], 1 }

</bundles_post_ra>
